<compile_context>
chip_gen: v7x
topology: tpu7x:2x2x1
jax: 0.10.0
libtpu: 0.0.40
codegen_flags: <defaults>
</compile_context>

<pallas_src>
import jax
import jax.numpy as jnp
from jax.experimental import pallas as pl
from jax.experimental.pallas import tpu as pltpu


# ----------------------------------------------------------------------------
# Kernels
# ----------------------------------------------------------------------------
def _policy_kernel(x_ref, wt_ref, b_ref, o_ref):
    """Simple path. x:(tb,I)  wt:(I,O) (pre-transposed)  b:(1,O)  o:(tb,O)."""
    logits = jnp.dot(x_ref[...], wt_ref[...], preferred_element_type=jnp.float32)
    logits = logits + b_ref[...]
    m = jnp.max(logits, axis=1, keepdims=True)          # numerically stable softmax
    e = jnp.exp(logits - m)
    denom = jnp.sum(e, axis=1, keepdims=True)
    o_ref[...] = (e / denom).astype(o_ref.dtype)         # exact divide: rows sum to 1


def _policy_kernel_packed(xp_ref, wbig_ref, bbig_ref, seg_ref, o_ref):
    """Lane-packed path: P = 128 // O rows per 128-lane vreg row.

    xp:(tbp, P*I)  wbig:(P*I, 128) block-diagonal copies of W^T
    bbig:(1, 128) tiled bias       seg:(128, 128) block-diagonal ones (OxO blocks)
    o:(tbp, 128) -- 128-lane-dense output (unmasked stores).
    """
    logits = jnp.dot(xp_ref[...], wbig_ref[...], preferred_element_type=jnp.float32)
    logits = logits + bbig_ref[...]
    # Max over the whole packed row: the same constant is subtracted from every
    # element of each O-wide segment, so per-segment softmax is unchanged and
    # all exponents are <= 0 (no overflow).  Assumes logit spread across the P
    # packed rows stays well below ~88 (always true for a policy head).
    m = jnp.max(logits, axis=1, keepdims=True)
    e = jnp.exp(logits - m)
    # Segmented O-lane row-sums via MXU matmul against block-diagonal ones;
    # every lane receives its own segment's sum.
    denom = jnp.dot(e, seg_ref[...], preferred_element_type=jnp.float32)
    o_ref[...] = (e / denom).astype(o_ref.dtype)


# ----------------------------------------------------------------------------
# pallas_call wrappers
# ----------------------------------------------------------------------------
def _forward_gridless(x, wt, b2):
    """Small-batch path: one invocation, no grid, everything resident in VMEM."""
    B = x.shape[0]
    O = wt.shape[1]
    vmem = pltpu.MemorySpace.VMEM
    return pl.pallas_call(
        _policy_kernel,
        out_shape=jax.ShapeDtypeStruct((B, O), jnp.float32),
        in_specs=[pl.BlockSpec(memory_space=vmem)] * 3,
        out_specs=pl.BlockSpec(memory_space=vmem),
    )(x, wt, b2)


def _forward_tiled_packed(xp, wbig, bbig, seg, block_p):
    """Batched lane-packed path: tile packed-batch axis; params stay resident."""
    Bp, IP = xp.shape
    OP = seg.shape[0]        # == 128 when 128 % O == 0
    return pl.pallas_call(
        _policy_kernel_packed,
        out_shape=jax.ShapeDtypeStruct((Bp, OP), jnp.float32),
        grid_spec=pltpu.PrefetchScalarGridSpec(
            num_scalar_prefetch=0,
            grid=(Bp // block_p,),
            in_specs=[
                pl.BlockSpec((block_p, IP), lambda i: (i, 0)),
                pl.BlockSpec((IP, OP), lambda i: (0, 0)),   # resident block-diag weight
                pl.BlockSpec((1, OP), lambda i: (0, 0)),    # resident tiled bias
                pl.BlockSpec((OP, OP), lambda i: (0, 0)),   # resident seg-sum ones
            ],
            out_specs=pl.BlockSpec((block_p, OP), lambda i: (i, 0)),
        ),
        compiler_params=pltpu.CompilerParams(
            dimension_semantics=("parallel",)),             # shard big tiles across TCs
    )(xp, wbig, bbig, seg)


def _forward_tiled_simple(x, wt, b2, block_b):
    """Fallback batched path when the output cannot be lane-packed."""
    B, I = x.shape
    O = wt.shape[1]
    return pl.pallas_call(
        _policy_kernel,
        out_shape=jax.ShapeDtypeStruct((B, O), jnp.float32),
        grid_spec=pltpu.PrefetchScalarGridSpec(
            num_scalar_prefetch=0,
            grid=(B // block_b,),
            in_specs=[
                pl.BlockSpec((block_b, I), lambda i: (i, 0)),
                pl.BlockSpec((I, O), lambda i: (0, 0)),
                pl.BlockSpec((1, O), lambda i: (0, 0)),
            ],
            out_specs=pl.BlockSpec((block_b, O), lambda i: (i, 0)),
        ),
        compiler_params=pltpu.CompilerParams(
            dimension_semantics=("parallel",)),
    )(x, wt, b2)


# ----------------------------------------------------------------------------
# Public entry point
# ----------------------------------------------------------------------------
_MIN_TILE_ROWS = 4096    # grid only pays off with >= this many rows per step
_MAX_TILE_ROWS = 32768   # ~10 MiB double-buffered blocks at I=32/O=8 f32 (v7x-safe)


def policy_network_forward(state, weight, bias, *, block_b=None):
    """state: (B, I) f32; weight: (O, I) f32 (PyTorch layout); bias: (O,) f32.

    block_b: optional batch tile size. If None, the gridless path is used for
    small batches and a large (>= _MIN_TILE_ROWS) tile for big batches.
    """
    state = jnp.asarray(state, jnp.float32)
    weight = jnp.asarray(weight, jnp.float32)
    bias = jnp.asarray(bias, jnp.float32)
    B, I = state.shape
    O = weight.shape[0]

    wt = weight.T                      # one-time tiny (O,I)->(I,O) transpose in the wrapper
    b2 = bias.reshape(1, O)

    # --- path selection ----------------------------------------------------
    if block_b is None:
        use_grid = B >= 2 * _MIN_TILE_ROWS
        block_b = min(_MAX_TILE_ROWS, B) if use_grid else B
    else:
        block_b = min(block_b, _MAX_TILE_ROWS)
        use_grid = block_b < B

    if not use_grid:
        return _forward_gridless(state, wt, b2)

    # --- batched, lane-packed path ------------------------------------------
    P = 128 // O if (128 % O == 0) else 0
    if P >= 2 and P * I <= 8192 and B >= P * 8:
        tile_quantum = P * 8                               # (8,128) block constraint
        block_b = max(tile_quantum, (block_b // tile_quantum) * tile_quantum)
        B_pad = pl.cdiv(B, block_b) * block_b              # pad instead of falling back
        xs = jnp.pad(state, ((0, B_pad - B), (0, 0))) if B_pad != B else state
        xp = xs.reshape(B_pad // P, P * I)                 # free reshape (rows contiguous)
        eye = jnp.eye(P, dtype=jnp.float32)
        wbig = jnp.kron(eye, wt)                           # (P*I, P*O) block-diagonal W^T
        bbig = jnp.tile(bias, P).reshape(1, P * O)
        seg = jnp.kron(eye, jnp.ones((O, O), jnp.float32)) # (P*O, P*O) segmented-sum ones
        out_p = _forward_tiled_packed(xp, wbig, bbig, seg, block_b // P)
        out = out_p.reshape(B_pad, O)                      # free reshape back
        return out[:B] if B_pad != B else out

    # --- batched fallback (output not packable) ------------------------------
    block_b = max(8, (block_b // 8) * 8)
    B_pad = pl.cdiv(B, block_b) * block_b
    xs = jnp.pad(state, ((0, B_pad - B), (0, 0))) if B_pad != B else state
    out = _forward_tiled_simple(xs, wt, b2, block_b)
    return out[:B] if B_pad != B else out


# ----------------------------------------------------------------------------
# Demo / self-test
# ----------------------------------------------------------------------------
if __name__ == "__main__":
    INPUT_SIZE, OUTPUT_SIZE = 32, 8

    key = jax.random.PRNGKey(0)
    k_x, k_w, k_b, k_xb = jax.random.split(key, 4)

    # Deterministic init mimicking nn.Linear's uniform(-1/sqrt(in), 1/sqrt(in))
    bound = 1.0 / jnp.sqrt(jnp.float32(INPUT_SIZE))
    weight = jax.random.uniform(k_w, (OUTPUT_SIZE, INPUT_SIZE), jnp.float32,
                                minval=-bound, maxval=bound)
    bias = jax.random.uniform(k_b, (OUTPUT_SIZE,), jnp.float32,
                              minval=-bound, maxval=bound)

    # --- small-batch (gridless) path ----------------------------------------
    B = 2
    state = jax.random.normal(k_x, (B, INPUT_SIZE), jnp.float32)
    probs = jax.block_until_ready(policy_network_forward(state, weight, bias))

    ref = jax.nn.softmax(state @ weight.T + bias, axis=1)
    assert probs.shape == (B, OUTPUT_SIZE)
    assert jnp.allclose(probs, ref, atol=1e-3, rtol=1e-3)
    assert jnp.allclose(jnp.sum(probs, axis=1), 1.0, atol=1e-3)

    # --- batched (tiled, lane-packed) path -----------------------------------
    # BB is deliberately not a multiple of the tile to exercise padding/slicing.
    BB = 4000
    state_b = jax.random.normal(k_xb, (BB, INPUT_SIZE), jnp.float32)
    probs_b = jax.block_until_ready(
        policy_network_forward(state_b, weight, bias, block_b=2048))

    ref_b = jax.nn.softmax(state_b @ weight.T + bias, axis=1)
    assert probs_b.shape == (BB, OUTPUT_SIZE)
    assert jnp.allclose(probs_b, ref_b, atol=1e-3, rtol=1e-3)
    assert jnp.allclose(jnp.sum(probs_b, axis=1), 1.0, atol=1e-3)

    print("KERNEL_OK")
</pallas_src>

<mosaic_0001>
module attributes {stable_mosaic.version = 11 : i64} {
  func.func @_policy_kernel(%arg0: memref<2x32xf32, #tpu.memory_space<vmem>>, %arg1: memref<32x8xf32, #tpu.memory_space<vmem>>, %arg2: memref<1x8xf32, #tpu.memory_space<vmem>>, %arg3: memref<2x8xf32, #tpu.memory_space<vmem>>) attributes {dimension_semantics = [], scalar_prefetch = 0 : i64, scratch_operands = 0 : i64, tpu.core_type = #tpu.core_type<tc>} {
    %c0 = arith.constant 0 : index
    %c0_0 = arith.constant 0 : index
    %0 = vector.load %arg0[%c0, %c0_0] : memref<2x32xf32, #tpu.memory_space<vmem>>, vector<2x32xf32>
    %c0_1 = arith.constant 0 : index
    %c0_2 = arith.constant 0 : index
    %1 = vector.load %arg1[%c0_1, %c0_2] : memref<32x8xf32, #tpu.memory_space<vmem>>, vector<32x8xf32>
    %cst = arith.constant dense<0.000000e+00> : vector<2x8xf32>
    %2 = tpu.matmul %0, %1, %cst {dimension_numbers = #tpu.dot_dimension_numbers<[1], [0], [0], [1], [0, 0, 1, 1], [], []>} : vector<2x32xf32>, vector<32x8xf32>, vector<2x8xf32> -> vector<2x8xf32>
    %c0_3 = arith.constant 0 : index
    %c0_4 = arith.constant 0 : index
    %3 = vector.load %arg2[%c0_3, %c0_4] : memref<1x8xf32, #tpu.memory_space<vmem>>, vector<1x8xf32>
    %4 = vector.broadcast %3 : vector<1x8xf32> to vector<2x8xf32>
    %5 = arith.addf %2, %4 : vector<2x8xf32>
    %cst_5 = arith.constant dense<0xFF800000> : vector<2xf32>
    %6 = vector.multi_reduction <maximumf>, %5, %cst_5 [1] : vector<2x8xf32> to vector<2xf32>
    %7 = vector.shape_cast %6 : vector<2xf32> to vector<2x1xf32>
    %8 = vector.broadcast %7 : vector<2x1xf32> to vector<2x8xf32>
    %9 = arith.subf %5, %8 : vector<2x8xf32>
    %10 = math.exp %9 : vector<2x8xf32>
    %cst_6 = arith.constant dense<0.000000e+00> : vector<2xf32>
    %11 = vector.multi_reduction <add>, %10, %cst_6 [1] : vector<2x8xf32> to vector<2xf32>
    %12 = vector.shape_cast %11 : vector<2xf32> to vector<2x1xf32>
    %13 = vector.broadcast %12 : vector<2x1xf32> to vector<2x8xf32>
    %14 = arith.divf %10, %13 : vector<2x8xf32>
    %c0_7 = arith.constant 0 : index
    %c0_8 = arith.constant 0 : index
    %15 = vector.load %arg3[%c0_7, %c0_8] : memref<2x8xf32, #tpu.memory_space<vmem>>, vector<2x8xf32>
    tpu.vector_store %arg3[%c0_7, %c0_8], %14 {strides = array<i32>} : memref<2x8xf32, #tpu.memory_space<vmem>>, vector<2x8xf32>,
    return
  }
}

</mosaic_0001>

<bundles_post_ra>
// kernel: tpu_custom_call.1
= control target key start
LH: loop header
LB: loop body
LE: loop exit
PB: predicated region body
PF: predicated region fallthrough
CT: control target
= control target key end

     0   :  { %v184_v3 = vmov 0.0|0.0   ;;  %vm185_vm0 = vmmov 0   ;;  %v186_v6 = vmov 0.0   ;;  %s241_s0 = inlined_call_operand.vmem [shape: f32[2,32], index: 0, kind: input, shape index: {}]   ;;  %s242_s1 = inlined_call_operand.vmem [shape: f32[32,8], index: 1, kind: input, shape index: {}]   ;;  %s243_s2 = inlined_call_operand.vmem [shape: f32[1,8], index: 2, kind: input, shape index: {}]   ;;  %s244_s3 = inlined_call_operand.hbm [shape: f32[2,8], index: 3, kind: output, shape index: {}]  }
   0x1   :  { %v16_v0 = vld [vmem:[%s242_s1] sm:$0xff]  ;;  %v17_v1 = vld [vmem:[%s242_s1 + $0x8] sm:$0xff]  ;;  %v18_v2 = vld [vmem:[%s242_s1 + $0x10] sm:$0xff]  ;;  %146 = vmatprep.subr.bf16.mxu0 %v184_v3  ;;  %143 = vmatprep.mubr.msk.f32.mxu0 %vm185_vm0, %v186_v6 }
   0x2   :  { %v147_v4 = vpack.c.bf16 %v17_v1, %v16_v0  ;;  %v19_v5 = vld [vmem:[%s242_s1 + $0x18] sm:$0xff] }
   0x3   :  { %8 = vsyncpa [#allocation3], 0  ;;  %v150_v7 = vpack.c.bf16 %v19_v5, %v18_v2  ;;  %v15_v8 = vld [vmem:[%s241_s0] sm:$0x3]  ;;  %vm27_vm1 = vcmask 261120   ;;  %vm101_vm2 = vcmask 58368  }
   0x4   :  { %148 = vmatpush3.bf16.msra.mxu0 %v147_v4  ;;  %v128_v9 = vld [vmem:[%s243_s2] ss:$0 sm:$0xff]  ;;  %s187_s0 = smov [#allocation2]  }
   0x5   :  { %149 = vmatprep.subr.bf16.mxu0 %v184_v3  ;;  %s120_s1 = sshll.u32 %s187_s0, 4  ;;  %s121_s1 = int_to_ptr.vmem [resolvable:$true] %s120_s1 }
   0x6   :  { %s160_s2 = scalar_lea.vmem %s121_s1, 32  ;;  %p165_p1 = scmp.lt.s32.totalorder %s121_s1, %s121_s1 }
   0x7   :  { %p161_p0 = scmp.ne.s32.totalorder %s121_s1, %s160_s2  ;;  %p166_p2 = scmp.lt.s32.totalorder %s160_s2, %s160_s2 }
   0x8   :  { %151 = vmatpush3.bf16.msra.mxu0 %v150_v7 }
   0x9   :  { %p167_p3 = por %p166_p2, %p165_p1 }
   0xb   :  { %144 = vmatmul.mubr.msk.f32.vlgmr.msra.gmra.mrb[0].mxu0 %vm27_vm1, %v15_v8  ;;  %p168_p4 = pnand %p167_p3, %p161_p0 }
  0xde   :  { %v97_v10 = vpop.f32.mrb[0].mxu0 }
  0xdf   :  { %v98_v11 = vadd.f32 %v128_v9, %v97_v10  ;;  %v145_v12 = vpop.f32.mrb[1].mxu0 }
  0xe1   :  { %v102_v13 = vsel %vm101_vm2, %v98_v11, -inf }
  0xe2   :  { %103 = vmax.xlane.f32.xlu0 %v102_v13 }
 0x16f   :  { %v104_v14 = vpop.xlane.xlu0 %103 }
 0x170   :  { %v105_v15 = vsub.f32 %v98_v11, %v104_v14 }
 0x172   :  { %v106_v16 = vmul.f32 1.442695, %v105_v15 }
 0x174   :  { %156 = vpow2.f32 %v106_v16 }
 0x17e   :  { %v157_v17 = vpop.eup %156 }
 0x17f   :  { %v108_v18 = vsel %vm101_vm2, %v157_v17, 0.0 }
 0x180   :  { %109 = vadd.xlane.f32.xlu0 %v108_v18 }
 0x20d   :  { %v110_v19 = vpop.xlane.xlu0 %109 }
 0x20e   :  { %158 = vrcp.f32 %v110_v19 }
 0x218   :  { %v159_v20 = vpop.eup %158 }
 0x219   :  { %v112_v21 = vmul.f32 %v159_v20, %v157_v17 }
 0x21b   :  { %113 = vst.msk [vmem:[#allocation2] sm:$0x3] %vm101_vm2, %v112_v21 }
 0x21c   :  { %171 = shalt.err (!%p168_p4)
}
 0x21d   :  { %s172_s26 = scalar_lea.hbm %s244_s3, 32 }
 0x21e   :  { %p173_p5 = scmp.ne.s32.totalorder %s244_s3, %s172_s26  ;;  %p176_p6 = scmp.lt.u32.totalorder %s172_s26, %s244_s3 }
 0x220   :  { %p178_p7 = pnand %p176_p6, %p173_p5 }
 0x222   :  { %181 = shalt.err (!%p178_p7)
}
 0x223   :  { %123 = dma.vmem_to_hbm [thread:$0]  %s121_s1, 32, %s244_s3, [#allocation3]  }
 0x224   :  { %182 = dma.done.wait [#allocation3], 32  }
 0x225   :  { %183 = vsyncadd [#allocation3], 4294967264 }
 0x226   :  { %127 = vsyncpa [#allocation3], 1 }

</bundles_post_ra>
